<compile_context>
chip_gen: v7x
topology: tpu7x:2x2x1
jax: 0.10.0
libtpu: 0.0.40
codegen_flags: <defaults>
</compile_context>

<pallas_src>
import functools
import random

import jax
import jax.numpy as jnp
from jax import lax
from jax.experimental import pallas as pl
from jax.experimental.pallas import tpu as pltpu


def _make_row_crop_kernel(H, csz):
    def row_crop_kernel(off_ref, x_ref, o_ref):
        # off_ref: SMEM int32[2] = (sx, sy); only sx is consumed in-kernel.
        # x_ref  : VMEM (B*C, H, W)         o_ref: VMEM (B*C, csz, W)
        #
        # Clamp so a bad host offset can never read out-of-bounds VMEM (OOB
        # VMEM loads are unchecked on TPU).  Host sampling keeps sx in range,
        # so this is a zero-cost scalar safety net, not a semantic change.
        sx = jnp.clip(off_ref[0], 0, H - csz)
        # One wide copy: dynamic start on the sublane (H) axis, full lane (W)
        # axis.  Pure data movement — no MXU, no gather, no per-row loop.
        o_ref[...] = x_ref[:, pl.ds(sx, csz), :]

    return row_crop_kernel


@functools.partial(jax.jit, static_argnames=("crop_size",))
def cropper_forward(x, offsets, crop_size):
    """x: (B, C, H, W); offsets: int32[2] = (sx, sy) -> (B, C, csz, csz)."""
    B, C, H, W = x.shape
    csz = crop_size
    BC = B * C

    xr = x.reshape(BC, H, W)  # leading-dim collapse only: no data movement

    # Row (sx) crop inside the Pallas kernel: (BC, H, W) -> (BC, csz, W).
    rows = pl.pallas_call(
        _make_row_crop_kernel(H, csz),
        out_shape=jax.ShapeDtypeStruct((BC, csz, W), x.dtype),
        in_specs=[
            pl.BlockSpec(memory_space=pltpu.MemorySpace.SMEM),   # (sx, sy)
            pl.BlockSpec(memory_space=pltpu.MemorySpace.VMEM),   # image planes
        ],
        out_specs=pl.BlockSpec(memory_space=pltpu.MemorySpace.VMEM),
    )(offsets, xr)

    # Column (sy) crop: tiny fused dynamic-slice along the lane axis (see the
    # header comment for why this stays outside the kernel at this toy width).
    sy = jnp.clip(offsets[1], 0, W - csz)
    out = lax.dynamic_slice_in_dim(rows, sy, csz, axis=2)
    return out.reshape(B, C, csz, csz)


if __name__ == "__main__":
    # Small shapes consistent with the module (img_size=16, crop_size=8).
    img_size, crop_size = 16, 8
    B, C = 2, 4

    key = jax.random.PRNGKey(0)
    x = jax.random.normal(key, (B, C, img_size, img_size), dtype=jnp.float32)

    # Deterministic "random" crop offsets, same sampling range as the module:
    # random.randint(0, isz - 1 - csz).
    rng = random.Random(0)
    sx = rng.randint(0, img_size - 1 - crop_size)
    sy = rng.randint(0, img_size - 1 - crop_size)
    offsets = jnp.array([sx, sy], dtype=jnp.int32)

    out = cropper_forward(x, offsets, crop_size)
    out = jax.block_until_ready(out)

    # Reference: pure JAX slicing == PyTorch x[:, :, sx:sx+csz, sy:sy+csz].
    ref = x[:, :, sx:sx + crop_size, sy:sy + crop_size]
    assert out.shape == (B, C, crop_size, crop_size)
    assert out.dtype == x.dtype
    assert jnp.allclose(out, ref)

    print("KERNEL_OK")
</pallas_src>

<mosaic_0001>
module attributes {stable_mosaic.version = 11 : i64} {
  func.func @row_crop_kernel(%arg0: memref<2xi32, #tpu.memory_space<smem>>, %arg1: memref<8x16x16xf32, #tpu.memory_space<vmem>>, %arg2: memref<8x8x16xf32, #tpu.memory_space<vmem>>) attributes {dimension_semantics = [], scalar_prefetch = 0 : i64, scratch_operands = 0 : i64, tpu.core_type = #tpu.core_type<tc>} {
    %c0 = arith.constant 0 : index
    %0 = memref.load %arg0[%c0] : memref<2xi32, #tpu.memory_space<smem>>
    %c0_i32 = arith.constant 0 : i32
    %c8_i32 = arith.constant 8 : i32
    %1 = arith.maxsi %c0_i32, %0 : i32
    %2 = arith.minsi %c8_i32, %1 : i32
    %c0_0 = arith.constant 0 : index
    %3 = arith.index_cast %2 : i32 to index
    %c0_1 = arith.constant 0 : index
    %4 = vector.load %arg1[%c0_0, %3, %c0_1] : memref<8x16x16xf32, #tpu.memory_space<vmem>>, vector<8x8x16xf32>
    %c0_2 = arith.constant 0 : index
    %c0_3 = arith.constant 0 : index
    %c0_4 = arith.constant 0 : index
    %5 = vector.load %arg2[%c0_2, %c0_3, %c0_4] : memref<8x8x16xf32, #tpu.memory_space<vmem>>, vector<8x8x16xf32>
    tpu.vector_store %arg2[%c0_2, %c0_3, %c0_4], %4 {strides = array<i32>} : memref<8x8x16xf32, #tpu.memory_space<vmem>>, vector<8x8x16xf32>,
    return
  }
}

</mosaic_0001>

<bundles_post_ra>
// kernel: cropper_forward.1
= control target key start
LH: loop header
LB: loop body
LE: loop exit
PB: predicated region body
PF: predicated region fallthrough
CT: control target
= control target key end

     0   :  { %7 = vsyncpa [#allocation4], 0  ;;  %s183_s0 = inlined_call_operand.vmem [shape: s32[2], index: 0, kind: input, shape index: {}]   ;;  %s184_s1 = inlined_call_operand.hbm [shape: f32[8,16,16], index: 1, kind: input, shape index: {}]   ;;  %s185_s2 = inlined_call_operand.vmem [shape: f32[8,8,16], index: 2, kind: output, shape index: {}]  }
   0x1   :  { %s15_s11 = sshll.u32 %s183_s0, 4  ;;  %s16_s11 = int_to_ptr.vmem [resolvable:$true] %s15_s11 }
   0x2   :  { %8 = vsyncpa [#allocation3], 0  ;;  %s79_s12 = scalar_lea.vmem %s16_s11, 16  ;;  %p84_p1 = scmp.lt.s32.totalorder %s16_s11, %s16_s11 }
   0x3   :  { %p80_p0 = scmp.ne.s32.totalorder %s16_s11, %s79_s12  ;;  %p85_p2 = scmp.lt.s32.totalorder %s79_s12, %s79_s12 }
   0x5   :  { %p86_p3 = por %p85_p2, %p84_p1 }
   0x7   :  { %p87_p4 = pnand %p86_p3, %p80_p0 }
   0x9   :  { %90 = shalt.err (!%p87_p4)
}
   0xa   :  { %s117_s13 = smov [#allocation2]   ;;  %s118_s14 = smov [#allocation5]  }
   0xb   :  { %18 = dma.vmem_to_smem %s16_s11, 16, %s117_s13, [#allocation4]  }
   0xc   :  { %s24_s15 = sshll.u32 %s118_s14, 4  ;;  %s91_s18 = scalar_lea.hbm %s184_s1, 2048  ;;  %s25_s15 = int_to_ptr.vmem [resolvable:$true] %s24_s15 }
   0xd   :  { %p92_p5 = scmp.ne.s32.totalorder %s184_s1, %s91_s18  ;;  %p95_p6 = scmp.lt.u32.totalorder %s91_s18, %s184_s1 }
   0xf   :  { %p97_p7 = pnand %p95_p6, %p92_p5 }
  0x11   :  { %100 = shalt.err (!%p97_p7)
}
  0x12   :  { %s101_s22 = scalar_lea.vmem %s25_s15, 2048  ;;  %p106_p9 = scmp.lt.s32.totalorder %s25_s15, %s25_s15 }
  0x13   :  { %p102_p8 = scmp.ne.s32.totalorder %s25_s15, %s101_s22  ;;  %p107_p10 = scmp.lt.s32.totalorder %s101_s22, %s101_s22 }
  0x15   :  { %p108_p11 = por %p107_p10, %p106_p9 }
  0x17   :  { %p109_p12 = pnand %p108_p11, %p102_p8 }
  0x19   :  { %112 = shalt.err (!%p109_p12)
}
  0x1a   :  { %s119_s23 = smov 128   ;;  %s120_s24 = smov 8  }
  0x1b   :  { %30 = dma.hbm_to_vmem [thread:$0]  %s184_s1, 2048, %s25_s15, [#allocation3], %s119_s23, %s119_s23, %s120_s24  }
  0x1c   :  { %113 = dma.done.wait [#allocation4], 16  }
  0x1d   :  { %114 = vsyncadd [#allocation4], 4294967280 }
  0x1e   :  { %115 = dma.done.wait [#allocation3], 2048  }
  0x1f   :  { %116 = vsyncadd [#allocation3], 4294965248 }
  0x20   :  { %37 = sfence }
  0x21   :  { %s38_s27 = sld [smem:[#allocation2]]  ;;  %vm52_vm0 = vcmask 130048  }
  0x27   :  { %p39_p13 = scmp.gt.s32.totalorder %s38_s27, 0  ;;  %p68_p0 = scmp.lt.s32.totalorder %s38_s27, 8 }
  0x29   :  { %s187_s27 = smov (!%p39_p13, %s38_s27), 0 }
  0x2a   :  { %s189_s27 = smov (!%p68_p0, %s187_s27), 8 }
  0x2b   :  { %s43_s28 = scalar_lea.vmem [#allocation5], %s189_s27 }
  0x2c   :  { %v44_v0 = vld [vmem:[%s43_s28] sm:$0xff]  ;;  %v45_v1 = vld [vmem:[%s43_s28 + $0x10] sm:$0xff] }
  0x2d   :  { %v46_v2 = vld [vmem:[%s43_s28 + $0x20] sm:$0xff]  ;;  %53 = vst.msk [vmem:[%s185_s2] sm:$0xff] %vm52_vm0, %v44_v0  ;;  %54 = vst.msk [vmem:[%s185_s2 + $0x8] sm:$0xff] %vm52_vm0, %v45_v1  ;;  %v47_v3 = vld [vmem:[%s43_s28 + $0x30] sm:$0xff] }
  0x2e   :  { %55 = vst.msk [vmem:[%s185_s2 + $0x10] sm:$0xff] %vm52_vm0, %v46_v2  ;;  %v48_v4 = vld [vmem:[%s43_s28 + $0x40] sm:$0xff]  ;;  %v49_v5 = vld [vmem:[%s43_s28 + $0x50] sm:$0xff]  ;;  %56 = vst.msk [vmem:[%s185_s2 + $0x18] sm:$0xff] %vm52_vm0, %v47_v3 }
  0x2f   :  { %57 = vst.msk [vmem:[%s185_s2 + $0x20] sm:$0xff] %vm52_vm0, %v48_v4  ;;  %58 = vst.msk [vmem:[%s185_s2 + $0x28] sm:$0xff] %vm52_vm0, %v49_v5  ;;  %v50_v6 = vld [vmem:[%s43_s28 + $0x60] sm:$0xff]  ;;  %v51_v7 = vld [vmem:[%s43_s28 + $0x70] sm:$0xff] }
  0x30   :  { %59 = vst.msk [vmem:[%s185_s2 + $0x30] sm:$0xff] %vm52_vm0, %v50_v6  ;;  %60 = vst.msk [vmem:[%s185_s2 + $0x38] sm:$0xff] %vm52_vm0, %v51_v7 }
  0x31   :  { %65 = vsyncpa [#allocation3], 1 }
  0x32   :  { %66 = vsyncpa [#allocation4], 1 }

</bundles_post_ra>
